<compile_context>
chip_gen: v5e
topology: v5e:2x2
jax: 0.10.0
libtpu: 0.0.40
codegen_flags: <defaults>
</compile_context>

<pallas_src>
import jax
import jax.numpy as jnp
from jax.experimental import pallas as pl
from jax.experimental.pallas import tpu as pltpu

LANES = 128
SUBLANES = 8
MAX_BLOCK_ROWS = 1024  # (1024, 128) f32 tile = 512 KiB per input


def _l1_pair_sum_kernel(ia_ref, ra_ref, ib_ref, rb_ref,
                        oa_ref, ob_ref, acc_a, acc_b):
    """Fused sum(|identity_A - real_A|) and sum(|identity_B - real_B|).

    Grid: (num_shards [parallel], blocks_per_shard [arbitrary, reduction]).
    Per-shard partial sums are written to oa_ref/ob_ref at the last inner step.
    """
    i = pl.program_id(1)

    @pl.when(i == 0)
    def _():
        acc_a[...] = jnp.zeros_like(acc_a)
        acc_b[...] = jnp.zeros_like(acc_b)

    # Hot loop: pure elementwise VPU adds, no cross-lane reduce, no scalar dep.
    acc_a[...] += jnp.abs(ia_ref[...].astype(jnp.float32)
                          - ra_ref[...].astype(jnp.float32))
    acc_b[...] += jnp.abs(ib_ref[...].astype(jnp.float32)
                          - rb_ref[...].astype(jnp.float32))

    @pl.when(i == pl.num_programs(1) - 1)
    def _():
        # Single final cross-lane/sublane reduce per shard.
        oa_ref[...] = jnp.sum(acc_a[...]).reshape(1, 1, 1)
        ob_ref[...] = jnp.sum(acc_b[...]).reshape(1, 1, 1)


def _round_up(x, m):
    return ((x + m - 1) // m) * m


def _flatten_to_rows(x, padded_rows):
    """Flatten to (padded_rows, 128); pad with zeros only if truly needed."""
    flat = x.reshape(-1)
    n = flat.shape[0]
    padded_n = padded_rows * LANES
    if padded_n != n:
        # TODO(synk): for ragged sizes an in-kernel iota mask on the final
        # block would avoid this full-array pad copy.
        flat = jnp.pad(flat, (0, padded_n - n))
    return flat.reshape(padded_rows, LANES)


def _fused_l1_sums(identity_A, real_A, identity_B, real_B):
    """Returns (sum|iA-rA|, sum|iB-rB|, n_A, n_B) with sums from one kernel."""
    n_a = identity_A.size
    n_b = identity_B.size
    rows_a = -(-n_a // LANES)
    rows_b = -(-n_b // LANES)
    max_rows = max(rows_a, rows_b)

    block_rows = min(MAX_BLOCK_ROWS, _round_up(max_rows, SUBLANES))
    padded_rows = _round_up(max_rows, block_rows)
    num_blocks = padded_rows // block_rows

    # Two shards when evenly splittable -> both TensorCores on v7x.
    num_shards = 2 if (num_blocks >= 2 and num_blocks % 2 == 0) else 1
    blocks_per_shard = num_blocks // num_shards

    ia = _flatten_to_rows(identity_A, padded_rows)
    ra = _flatten_to_rows(real_A, padded_rows)
    ib = _flatten_to_rows(identity_B, padded_rows)
    rb = _flatten_to_rows(real_B, padded_rows)

    def in_map(c, i):
        return (c * blocks_per_shard + i, 0)

    def out_map(c, i):
        return (c, 0, 0)

    in_spec = pl.BlockSpec((block_rows, LANES), in_map)
    out_spec = pl.BlockSpec((1, 1, 1), out_map)

    sum_a, sum_b = pl.pallas_call(
        _l1_pair_sum_kernel,
        out_shape=(
            jax.ShapeDtypeStruct((num_shards, 1, 1), jnp.float32),
            jax.ShapeDtypeStruct((num_shards, 1, 1), jnp.float32),
        ),
        grid_spec=pltpu.PrefetchScalarGridSpec(
            num_scalar_prefetch=0,
            grid=(num_shards, blocks_per_shard),
            in_specs=[in_spec, in_spec, in_spec, in_spec],
            out_specs=(out_spec, out_spec),
            scratch_shapes=[
                pltpu.VMEM((block_rows, LANES), jnp.float32),
                pltpu.VMEM((block_rows, LANES), jnp.float32),
            ],
        ),
        compiler_params=pltpu.CompilerParams(
            dimension_semantics=("parallel", "arbitrary"),
        ),
    )(ia, ra, ib, rb)

    # Tiny final add of per-shard partials (1 or 2 values each) in plain JAX.
    return jnp.sum(sum_a), jnp.sum(sum_b), n_a, n_b


def identity_loss(real_A, identity_A, real_B, identity_B, lambda_identity=0.5):
    sum_A, sum_B, n_A, n_B = _fused_l1_sums(identity_A, real_A,
                                            identity_B, real_B)
    id_loss_A = (sum_A / jnp.float32(n_A)) * jnp.float32(lambda_identity)
    id_loss_B = (sum_B / jnp.float32(n_B)) * jnp.float32(lambda_identity)
    total_id_loss = id_loss_A + id_loss_B
    return {
        "id_loss_A": id_loss_A,
        "id_loss_B": id_loss_B,
        "total_id_loss": total_id_loss,
    }


if __name__ == "__main__":
    key = jax.random.PRNGKey(0)
    k1, k2, k3, k4 = jax.random.split(key, 4)
    shape = (2, 4, 16, 16)  # NCHW
    real_A = jax.random.normal(k1, shape, dtype=jnp.float32)
    identity_A = jax.random.normal(k2, shape, dtype=jnp.float32)
    real_B = jax.random.normal(k3, shape, dtype=jnp.float32)
    identity_B = jax.random.normal(k4, shape, dtype=jnp.float32)

    out = identity_loss(real_A, identity_A, real_B, identity_B,
                        lambda_identity=0.5)
    out = jax.block_until_ready(out)

    # Reference check in plain JAX
    ref_A = jnp.mean(jnp.abs(identity_A - real_A)) * 0.5
    ref_B = jnp.mean(jnp.abs(identity_B - real_B)) * 0.5
    assert jnp.allclose(out["id_loss_A"], ref_A, rtol=1e-5, atol=1e-6)
    assert jnp.allclose(out["id_loss_B"], ref_B, rtol=1e-5, atol=1e-6)
    assert jnp.allclose(out["total_id_loss"], ref_A + ref_B,
                        rtol=1e-5, atol=1e-6)

    print("KERNEL_OK")
</pallas_src>

<mosaic_0001>
module attributes {stable_mosaic.version = 11 : i64} {
  func.func @_l1_pair_sum_kernel(%arg0: i32, %arg1: i32, %arg2: memref<16x128xf32, #tpu.memory_space<vmem>>, %arg3: memref<16x128xf32, #tpu.memory_space<vmem>>, %arg4: memref<16x128xf32, #tpu.memory_space<vmem>>, %arg5: memref<16x128xf32, #tpu.memory_space<vmem>>, %arg6: memref<1x1x1xf32, #tpu.memory_space<vmem>>, %arg7: memref<1x1x1xf32, #tpu.memory_space<vmem>>, %arg8: memref<16x128xf32, #tpu.memory_space<vmem>>, %arg9: memref<16x128xf32, #tpu.memory_space<vmem>>) attributes {dimension_semantics = [#tpu.dimension_semantics<parallel>, #tpu.dimension_semantics<arbitrary>], iteration_bounds = array<i64: 1, 1>, scalar_prefetch = 0 : i64, scratch_operands = 2 : i64, tpu.core_type = #tpu.core_type<tc>, window_params = [{transform_indices = @transform_0, window_bounds = array<i64: 16, 128>}, {transform_indices = @transform_1, window_bounds = array<i64: 16, 128>}, {transform_indices = @transform_2, window_bounds = array<i64: 16, 128>}, {transform_indices = @transform_3, window_bounds = array<i64: 16, 128>}, {transform_indices = @transform_4, window_bounds = array<i64: 1, 1, 1>}, {transform_indices = @transform_5, window_bounds = array<i64: 1, 1, 1>}]} {
    %c0_i32 = arith.constant 0 : i32
    %0 = arith.cmpi eq, %arg1, %c0_i32 : i32
    %1 = arith.extui %0 : i1 to i32
    %c0_i32_0 = arith.constant 0 : i32
    %2 = arith.cmpi ne, %1, %c0_i32_0 : i32
    scf.if %2 {
      %cst = arith.constant 0.000000e+00 : f32
      %20 = vector.broadcast %cst : f32 to vector<16x128xf32>
      %c0_18 = arith.constant 0 : index
      %c0_19 = arith.constant 0 : index
      %21 = vector.load %arg8[%c0_18, %c0_19] : memref<16x128xf32, #tpu.memory_space<vmem>>, vector<16x128xf32>
      tpu.vector_store %arg8[%c0_18, %c0_19], %20 {strides = array<i32>} : memref<16x128xf32, #tpu.memory_space<vmem>>, vector<16x128xf32>,
      %cst_20 = arith.constant 0.000000e+00 : f32
      %22 = vector.broadcast %cst_20 : f32 to vector<16x128xf32>
      %c0_21 = arith.constant 0 : index
      %c0_22 = arith.constant 0 : index
      %23 = vector.load %arg9[%c0_21, %c0_22] : memref<16x128xf32, #tpu.memory_space<vmem>>, vector<16x128xf32>
      tpu.vector_store %arg9[%c0_21, %c0_22], %22 {strides = array<i32>} : memref<16x128xf32, #tpu.memory_space<vmem>>, vector<16x128xf32>,
    } else {
    }
    %c0 = arith.constant 0 : index
    %c0_1 = arith.constant 0 : index
    %3 = vector.load %arg8[%c0, %c0_1] : memref<16x128xf32, #tpu.memory_space<vmem>>, vector<16x128xf32>
    %c0_2 = arith.constant 0 : index
    %c0_3 = arith.constant 0 : index
    %4 = vector.load %arg2[%c0_2, %c0_3] : memref<16x128xf32, #tpu.memory_space<vmem>>, vector<16x128xf32>
    %c0_4 = arith.constant 0 : index
    %c0_5 = arith.constant 0 : index
    %5 = vector.load %arg3[%c0_4, %c0_5] : memref<16x128xf32, #tpu.memory_space<vmem>>, vector<16x128xf32>
    %6 = arith.subf %4, %5 : vector<16x128xf32>
    %7 = math.absf %6 : vector<16x128xf32>
    %8 = arith.addf %3, %7 : vector<16x128xf32>
    %c0_6 = arith.constant 0 : index
    %c0_7 = arith.constant 0 : index
    %9 = vector.load %arg8[%c0_6, %c0_7] : memref<16x128xf32, #tpu.memory_space<vmem>>, vector<16x128xf32>
    tpu.vector_store %arg8[%c0_6, %c0_7], %8 {strides = array<i32>} : memref<16x128xf32, #tpu.memory_space<vmem>>, vector<16x128xf32>,
    %c0_8 = arith.constant 0 : index
    %c0_9 = arith.constant 0 : index
    %10 = vector.load %arg9[%c0_8, %c0_9] : memref<16x128xf32, #tpu.memory_space<vmem>>, vector<16x128xf32>
    %c0_10 = arith.constant 0 : index
    %c0_11 = arith.constant 0 : index
    %11 = vector.load %arg4[%c0_10, %c0_11] : memref<16x128xf32, #tpu.memory_space<vmem>>, vector<16x128xf32>
    %c0_12 = arith.constant 0 : index
    %c0_13 = arith.constant 0 : index
    %12 = vector.load %arg5[%c0_12, %c0_13] : memref<16x128xf32, #tpu.memory_space<vmem>>, vector<16x128xf32>
    %13 = arith.subf %11, %12 : vector<16x128xf32>
    %14 = math.absf %13 : vector<16x128xf32>
    %15 = arith.addf %10, %14 : vector<16x128xf32>
    %c0_14 = arith.constant 0 : index
    %c0_15 = arith.constant 0 : index
    %16 = vector.load %arg9[%c0_14, %c0_15] : memref<16x128xf32, #tpu.memory_space<vmem>>, vector<16x128xf32>
    tpu.vector_store %arg9[%c0_14, %c0_15], %15 {strides = array<i32>} : memref<16x128xf32, #tpu.memory_space<vmem>>, vector<16x128xf32>,
    %c0_i32_16 = arith.constant 0 : i32
    %17 = arith.cmpi eq, %arg1, %c0_i32_16 : i32
    %18 = arith.extui %17 : i1 to i32
    %c0_i32_17 = arith.constant 0 : i32
    %19 = arith.cmpi ne, %18, %c0_i32_17 : i32
    scf.if %19 {
      %c0_18 = arith.constant 0 : index
      %c0_19 = arith.constant 0 : index
      %20 = vector.load %arg8[%c0_18, %c0_19] : memref<16x128xf32, #tpu.memory_space<vmem>>, vector<16x128xf32>
      %21 = vector.shape_cast %20 : vector<16x128xf32> to vector<1x16x128xf32>
      %cst = arith.constant dense<0.000000e+00> : vector<1xf32>
      %22 = vector.multi_reduction <add>, %21, %cst [1, 2] : vector<1x16x128xf32> to vector<1xf32>
      %23 = vector.shape_cast %22 : vector<1xf32> to vector<1x1x1xf32>
      %24 = vector.extract %23[0, 0, 0] : f32 from vector<1x1x1xf32>
      %25 = vector.broadcast %24 : f32 to vector<1x1x1xf32>
      %c0_20 = arith.constant 0 : index
      %c0_21 = arith.constant 0 : index
      %c0_22 = arith.constant 0 : index
      %26 = vector.load %arg6[%c0_20, %c0_21, %c0_22] : memref<1x1x1xf32, #tpu.memory_space<vmem>>, vector<1x1x1xf32>
      tpu.vector_store %arg6[%c0_20, %c0_21, %c0_22], %25 {strides = array<i32>} : memref<1x1x1xf32, #tpu.memory_space<vmem>>, vector<1x1x1xf32>,
      %c0_23 = arith.constant 0 : index
      %c0_24 = arith.constant 0 : index
      %27 = vector.load %arg9[%c0_23, %c0_24] : memref<16x128xf32, #tpu.memory_space<vmem>>, vector<16x128xf32>
      %28 = vector.shape_cast %27 : vector<16x128xf32> to vector<1x16x128xf32>
      %cst_25 = arith.constant dense<0.000000e+00> : vector<1xf32>
      %29 = vector.multi_reduction <add>, %28, %cst_25 [1, 2] : vector<1x16x128xf32> to vector<1xf32>
      %30 = vector.shape_cast %29 : vector<1xf32> to vector<1x1x1xf32>
      %31 = vector.extract %30[0, 0, 0] : f32 from vector<1x1x1xf32>
      %32 = vector.broadcast %31 : f32 to vector<1x1x1xf32>
      %c0_26 = arith.constant 0 : index
      %c0_27 = arith.constant 0 : index
      %c0_28 = arith.constant 0 : index
      %33 = vector.load %arg7[%c0_26, %c0_27, %c0_28] : memref<1x1x1xf32, #tpu.memory_space<vmem>>, vector<1x1x1xf32>
      tpu.vector_store %arg7[%c0_26, %c0_27, %c0_28], %32 {strides = array<i32>} : memref<1x1x1xf32, #tpu.memory_space<vmem>>, vector<1x1x1xf32>,
    } else {
    }
    return
  }
  func.func @transform_0(%arg0: i32, %arg1: i32) -> (i32, i32) {
    %c1_i32 = arith.constant 1 : i32
    %0 = arith.muli %arg0, %c1_i32 : i32
    %1 = arith.addi %0, %arg1 : i32
    %c0_i32 = arith.constant 0 : i32
    %c0_i32_0 = arith.constant 0 : i32
    return %1, %c0_i32 : i32, i32
  }
  func.func @transform_1(%arg0: i32, %arg1: i32) -> (i32, i32) {
    %c1_i32 = arith.constant 1 : i32
    %0 = arith.muli %arg0, %c1_i32 : i32
    %1 = arith.addi %0, %arg1 : i32
    %c0_i32 = arith.constant 0 : i32
    %c0_i32_0 = arith.constant 0 : i32
    return %1, %c0_i32 : i32, i32
  }
  func.func @transform_2(%arg0: i32, %arg1: i32) -> (i32, i32) {
    %c1_i32 = arith.constant 1 : i32
    %0 = arith.muli %arg0, %c1_i32 : i32
    %1 = arith.addi %0, %arg1 : i32
    %c0_i32 = arith.constant 0 : i32
    %c0_i32_0 = arith.constant 0 : i32
    return %1, %c0_i32 : i32, i32
  }
  func.func @transform_3(%arg0: i32, %arg1: i32) -> (i32, i32) {
    %c1_i32 = arith.constant 1 : i32
    %0 = arith.muli %arg0, %c1_i32 : i32
    %1 = arith.addi %0, %arg1 : i32
    %c0_i32 = arith.constant 0 : i32
    %c0_i32_0 = arith.constant 0 : i32
    return %1, %c0_i32 : i32, i32
  }
  func.func @transform_4(%arg0: i32, %arg1: i32) -> (i32, i32, i32) {
    %c0_i32 = arith.constant 0 : i32
    %c0_i32_0 = arith.constant 0 : i32
    %c0_i32_1 = arith.constant 0 : i32
    return %arg0, %c0_i32, %c0_i32_0 : i32, i32, i32
  }
  func.func @transform_5(%arg0: i32, %arg1: i32) -> (i32, i32, i32) {
    %c0_i32 = arith.constant 0 : i32
    %c0_i32_0 = arith.constant 0 : i32
    %c0_i32_1 = arith.constant 0 : i32
    return %arg0, %c0_i32, %c0_i32_0 : i32, i32, i32
  }
}

</mosaic_0001>

<bundles_post_ra>
// kernel: tpu_custom_call.1
= control target key start
LH: loop header
LB: loop body
LE: loop exit
PB: predicated region body
PF: predicated region fallthrough
CT: control target
= control target key end

     0   :  { %11 = vsyncpa [#allocation5], 0  ;;  %s433_s0 = inlined_call_operand.hbm [shape: f32[16,128], index: 0, kind: input, shape index: {}]   ;;  %s434_s1 = inlined_call_operand.hbm [shape: f32[16,128], index: 1, kind: input, shape index: {}]   ;;  %s435_s2 = inlined_call_operand.hbm [shape: f32[16,128], index: 2, kind: input, shape index: {}]   ;;  %s436_s3 = inlined_call_operand.hbm [shape: f32[16,128], index: 3, kind: input, shape index: {}]   ;;  %s437_s4 = inlined_call_operand.hbm [shape: f32[1,1,1], index: 4, kind: output, shape index: {0}]   ;;  %s438_s5 = inlined_call_operand.hbm [shape: f32[1,1,1], index: 5, kind: output, shape index: {1}]  }
   0x1   :  { %12 = vsyncpa [#allocation8], 0 }
   0x2   :  { %13 = vsyncpa [#allocation11], 0 }
   0x3   :  { %14 = vsyncpa [#allocation6], 0 }
   0x4   :  { %15 = vsyncpa [#allocation14], 0  ;;  %s41_s20 = sshll.u32 %s434_s1, 4  ;;  %s377_s21 = smov [#allocation7]   ;;  %s42_s20 = int_to_ptr.hbm [resolvable:$true] %s41_s20 }
   0x5   :  { %s43_s22 = sshll.u32 %s377_s21, 4  ;;  %s24_s25 = sshll.u32 %s433_s0, 4  ;;  %s44_s22 = int_to_ptr.vmem [resolvable:$true] %s43_s22  ;;  %s25_s25 = int_to_ptr.hbm [resolvable:$true] %s24_s25 }
   0x6   :  { %s378_s26 = smov 128   ;;  %s379_s27 = smov 8  }
   0x7   :  { %49 = dma.hbm_to_vmem [thread:$0]  %s42_s20, 256, %s44_s22, [#allocation8], %s378_s26, %s378_s26, %s379_s27  }
   0x8   :  { %s380_s28 = smov [#allocation4]   ;;  %s58_s7 = sshll.u32 %s435_s2, 4  ;;  %s59_s7 = int_to_ptr.hbm [resolvable:$true] %s58_s7 }
   0x9   :  { %s26_s29 = sshll.u32 %s380_s28, 4  ;;  %s75_s9 = sshll.u32 %s436_s3, 4  ;;  %s27_s29 = int_to_ptr.vmem [resolvable:$true] %s26_s29  ;;  %s76_s9 = int_to_ptr.hbm [resolvable:$true] %s75_s9 }
   0xa   :  { %32 = dma.hbm_to_vmem [thread:$0]  %s25_s25, 256, %s27_s29, [#allocation5], %s378_s26, %s378_s26, %s379_s27  }
   0xb   :  { %s381_s10 = smov [#allocation9]   ;;  %s382_s0 = smov [#allocation10]  }
   0xc   :  { %s60_s11 = sshll.u32 %s381_s10, 4  ;;  %s77_s12 = sshll.u32 %s382_s0, 4  ;;  %s61_s11 = int_to_ptr.vmem [resolvable:$true] %s60_s11  ;;  %s78_s12 = int_to_ptr.vmem [resolvable:$true] %s77_s12 }
   0xd   :  { %66 = dma.hbm_to_vmem [thread:$0]  %s59_s7, 256, %s61_s11, [#allocation8], %s378_s26, %s378_s26, %s379_s27  }
   0xe   :  { %83 = dma.hbm_to_vmem [thread:$0]  %s76_s9, 256, %s78_s12, [#allocation11], %s378_s26, %s378_s26, %s379_s27  }
   0xf   :  { %367 = dma.done.wait [#allocation5], 256  }
  0x10   :  { %368 = vsyncadd [#allocation5], 4294967040 }
  0x11   :  { %369 = dma.done.wait [#allocation8], 512  }
  0x12   :  { %370 = vsyncadd [#allocation8], 4294966784 }
  0x13   :  { %371 = dma.done.wait [#allocation11], 256  }
  0x14   :  { %372 = vsyncadd [#allocation11], 4294967040  ;;  %v118_v0 = vld [vmem:[#allocation4] sm:$0xff]  ;;  %v119_v1 = vld [vmem:[#allocation4 + $0x8] sm:$0xff]  ;;  %s383_s2 = smov [#allocation12]   ;;  %s183_s15 = sshll.u32 %s437_s4, 4  ;;  %s184_s15 = int_to_ptr.hbm [resolvable:$true] %s183_s15 }
  0x15   :  { %v120_v2 = vld [vmem:[#allocation7] sm:$0xff]  ;;  %v121_v3 = vld [vmem:[#allocation7 + $0x8] sm:$0xff]  ;;  %v132_v5 = vld [vmem:[#allocation9] sm:$0xff]  ;;  %s181_s3 = sshll.u32 %s383_s2, 4  ;;  %vm160_vm0 = vcmask 0   ;;  %s384_s17 = smov [#allocation13]   ;;  %s182_s3 = int_to_ptr.vmem [resolvable:$true] %s181_s3 }
  0x16   :  { %v122_v4 = vsub.f32 %v118_v0, %v120_v2  ;;  %v133_v6 = vld [vmem:[#allocation9 + $0x8] sm:$0xff]  ;;  %v123_v7 = vsub.f32 %v119_v1, %v121_v3  ;;  %v134_v8 = vld [vmem:[#allocation10] sm:$0xff]  ;;  %v135_v9 = vld [vmem:[#allocation10 + $0x8] sm:$0xff]  ;;  %s192_s18 = sshll.u32 %s384_s17, 4  ;;  %s194_s21 = sshll.u32 %s438_s5, 4  ;;  %s193_s18 = int_to_ptr.vmem [resolvable:$true] %s192_s18  ;;  %s195_s21 = int_to_ptr.hbm [resolvable:$true] %s194_s21 }
  0x17   :  { %v136_v12 = vsub.f32 %v132_v5, %v134_v8  ;;  %v137_v13 = vsub.f32 %v133_v6, %v135_v9 }
  0x18   :  { %v124_v10 = vand.u32 2147483647, %v122_v4  ;;  %v125_v11 = vand.u32 2147483647, %v123_v7 }
  0x19   :  { %v138_v15 = vand.u32 2147483647, %v136_v12  ;;  %v139_v16 = vand.u32 2147483647, %v137_v13 }
  0x1a   :  { %v149_v14 = vadd.f32 %v125_v11, %v124_v10 }
  0x1b   :  { %v164_v17 = vadd.f32 %v139_v16, %v138_v15 }
  0x1c   :  { %150 = vadd.xlane.f32.xlu0 %v149_v14 }
  0x24   :  { %165 = vadd.xlane.f32.xlu0 %v164_v17 }
  0x8f   :  { %v151_v18 = vpop.xlane.xlu0 %150 }
  0x90   :  { %v152_v19 = vrot.slane %v151_v18, 4 }
  0x92   :  { %v153_v20 = vadd.f32 %v152_v19, %v151_v18 }
  0x94   :  { %v154_v21 = vrot.slane %v153_v20, 2 }
  0x96   :  { %v155_v22 = vadd.f32 %v154_v21, %v153_v20 }
  0x97   :  { %v166_v23 = vpop.xlane.xlu0 %165 }
  0x98   :  { %v167_v24 = vrot.slane %v166_v23, 4  ;;  %v156_v25 = vrot.slane %v155_v22, 1 }
  0x9a   :  { %v168_v26 = vadd.f32 %v167_v24, %v166_v23  ;;  %v157_v27 = vadd.f32 %v156_v25, %v155_v22 }
  0x9c   :  { %v169_v28 = vrot.slane %v168_v26, 2  ;;  %211 = vpush %v157_v27 }
  0x9e   :  { %v170_v29 = vadd.f32 %v169_v28, %v168_v26 }
  0xa0   :  { %v171_v30 = vrot.slane %v170_v29, 1 }
  0xa2   :  { %v172_v31 = vadd.f32 %v171_v30, %v170_v29 }
  0xa4   :  { %213 = vpush %v172_v31 }
  0xcd   :  { %s212_s16 = spop %211 }
  0xce   :  { %v159_v32 = vstv %s212_s16 }
  0xcf   :  { %161 = vst.msk [vmem:[#allocation12] sm:$0x1] %vm160_vm0, %v159_v32 }
  0xd0   :  { %186 = dma.vmem_to_hbm [thread:$0]  %s182_s3, 16, %s184_s15, [#allocation6]  }
  0xd5   :  { %s214_s22 = spop %213 }
  0xd6   :  { %v174_v33 = vstv %s214_s22 }
  0xd7   :  { %175 = vst.msk [vmem:[#allocation13] sm:$0x1] %vm160_vm0, %v174_v33 }
  0xd8   :  { %197 = dma.vmem_to_hbm [thread:$0]  %s193_s18, 16, %s195_s21, [#allocation14]  }
  0xd9   :  { %373 = dma.done.wait [#allocation6], 16  }
  0xda   :  { %374 = vsyncadd [#allocation6], 4294967280 }
  0xdb   :  { %375 = dma.done.wait [#allocation14], 16  }
  0xdc   :  { %376 = vsyncadd [#allocation14], 4294967280 }
  0xdd   :  { %206 = vsyncpa [#allocation5], 1 }
  0xde   :  { %207 = vsyncpa [#allocation8], 1 }
  0xdf   :  { %208 = vsyncpa [#allocation11], 1 }
  0xe0   :  { %209 = vsyncpa [#allocation6], 1 }
  0xe1   :  { %210 = vsyncpa [#allocation14], 1 }

</bundles_post_ra>
